<compile_context>
chip_gen: v6e
topology: v6e:2x2x1
jax: 0.10.0
libtpu: 0.0.40
codegen_flags: <defaults>
</compile_context>

<pallas_src>
import functools

import jax
import jax.numpy as jnp
from jax.experimental import pallas as pl
from jax.experimental.pallas import tpu as pltpu

TIME_NUM = 288
EMBED_SIZE = 32
N_DEFAULT = 25
T_DEFAULT = 12
BB = 8  # batch elements (time indices) handled per grid step


def _onehot_gather_kernel(idx_ref, tbl_ref, out_ref):
    # idx_ref: SMEM (B_pad,) int32 scalar-prefetch vector, values in [0, time_num)
    # tbl_ref: VMEM (time_num + T, embed) f32, wrapped (I @ W^T + bias) table
    # out_ref: VMEM (BB, T, embed) f32 output block for this grid step
    base = pl.program_id(0) * BB
    T = out_ref.shape[1]
    # Static unroll over the BB batch elements of this grid step; each one is
    # a circular T-row gather expressed as a plain dynamic sublane slice
    # (table is pre-wrapped by T rows, so start + T never exceeds the table).
    for j in range(BB):
        start = idx_ref[base + j]                      # scalar-unit SMEM read
        out_ref[j] = tbl_ref[pl.ds(start, T), :]       # (T, embed) copy, exact


def prepare_params(I_param, weight, bias, T=T_DEFAULT):
    """Hoisted, once-per-model precompute.

    Returns the wrapped gather table of shape (time_num + T, embed):
      row r (r < time_num)        ->  I[r, :] @ W^T + b
      row time_num + t (t < T)    ->  I[t, :] @ W^T + b   (wrap-around rows)
    """
    assert T <= TIME_NUM, "T must be <= time_num for the wrapped table"
    IWb = (jnp.dot(I_param.astype(jnp.float32), weight.astype(jnp.float32).T)
           + bias.astype(jnp.float32)[None, :])            # (time_num, embed)
    table = jnp.concatenate([IWb, IWb[:T]], axis=0)         # (time_num+T, embed)
    return table


@functools.partial(jax.jit, static_argnames=("T",))
def one_hot_encoder_batched(i_vec, table, T=T_DEFAULT):
    """Batched launch: i_vec is (B,) int of time indices.
    Returns (B, T, embed) float32 slabs (before the N-expand)."""
    assert T <= TIME_NUM
    embed = table.shape[1]
    assert table.shape[0] == TIME_NUM + T, "table must be built with the same T"

    B = i_vec.shape[0]
    B_pad = ((B + BB - 1) // BB) * BB
    # jnp.mod matches Python % for negative i (always lands in [0, time_num)).
    i_mod = jnp.mod(i_vec.astype(jnp.int32), TIME_NUM)
    i_pad = jnp.pad(i_mod, (0, B_pad - B))                   # padded with 0s

    grid_spec = pltpu.PrefetchScalarGridSpec(
        num_scalar_prefetch=1,            # i_pad -> SMEM, passed to kernel
        grid=(B_pad // BB,),
        in_specs=[
            # Full-array block + constant index map: DMA'd into VMEM once.
            pl.BlockSpec((TIME_NUM + T, embed), lambda g, idx: (0, 0)),
        ],
        out_specs=pl.BlockSpec((BB, T, embed), lambda g, idx: (g, 0, 0)),
    )

    out = pl.pallas_call(
        _onehot_gather_kernel,
        out_shape=jax.ShapeDtypeStruct((B_pad, T, embed), jnp.float32),
        grid_spec=grid_spec,
        compiler_params=pltpu.CompilerParams(
            dimension_semantics=("arbitrary",)),
    )(i_pad, table)
    return out[:B]


def one_hot_encoder_forward(i, table, N=N_DEFAULT, T=T_DEFAULT):
    """Matches One_hot_encoder.forward(i, N, T): returns (N, T, embed)."""
    # TODO(synk): for the single-i production path, fuse this gather into the
    # consuming kernel (or use lax.dynamic_slice on `table` in XLA); a
    # standalone B=1 pallas_call is dominated by fixed launch overhead.
    i_vec = jnp.asarray([i], dtype=jnp.int32)
    out_te = one_hot_encoder_batched(i_vec, table, T=T)[0]   # (T, embed)
    # expand(N, T, time_num) before the Linear is a pure broadcast -> free glue
    return jnp.broadcast_to(out_te[None, :, :], (N, T, table.shape[1]))


def _reference(i, I_param, weight, bias, N=N_DEFAULT, T=T_DEFAULT):
    """Pure-JAX mirror of the PyTorch forward (both wrap / no-wrap branches)."""
    start = i % TIME_NUM
    rows = (start + jnp.arange(T)) % TIME_NUM
    onehot = I_param[rows, :]                      # circular T-row slice of I
    out = onehot @ weight.T + bias                 # (T, embed)
    return jnp.broadcast_to(out[None], (N, T, weight.shape[0]))


if __name__ == "__main__":
    key = jax.random.PRNGKey(0)
    k_w, k_b = jax.random.split(key)

    # Deterministic parameter init (shapes from One_hot_encoder.__init__):
    I_param = jnp.eye(TIME_NUM, dtype=jnp.float32)           # nn.Parameter(eye)
    bound = 1.0 / (TIME_NUM ** 0.5)
    weight = jax.random.uniform(k_w, (EMBED_SIZE, TIME_NUM),
                                minval=-bound, maxval=bound, dtype=jnp.float32)
    bias = jax.random.uniform(k_b, (EMBED_SIZE,),
                              minval=-bound, maxval=bound, dtype=jnp.float32)

    # One-time hoisted precompute (out of the per-call hot path).
    table = prepare_params(I_param, weight, bias, T=T_DEFAULT)

    # Single-i forward: i=5 exercises the plain branch, i=283 the wrap branch.
    for i in (5, 283):
        out = jax.block_until_ready(
            one_hot_encoder_forward(i, table, N=N_DEFAULT, T=T_DEFAULT))
        ref = _reference(i, I_param, weight, bias, N=N_DEFAULT, T=T_DEFAULT)
        assert out.shape == (N_DEFAULT, T_DEFAULT, EMBED_SIZE)
        assert jnp.allclose(out, ref, atol=1e-5, rtol=1e-5), f"mismatch at i={i}"

    # Batched launch: many i's amortize launch + table-DMA overhead
    # (includes wrap, >time_num and negative indices).
    i_list = [0, 5, 100, 283, 287, 300, 575, -3]
    i_batch = jnp.array(i_list, dtype=jnp.int32)
    out_b = jax.block_until_ready(
        one_hot_encoder_batched(i_batch, table, T=T_DEFAULT))
    for bi, i in enumerate(i_list):
        ref = _reference(i, I_param, weight, bias, N=1, T=T_DEFAULT)[0]
        assert jnp.allclose(out_b[bi], ref, atol=1e-5, rtol=1e-5), \
            f"batched mismatch at i={i}"

    print("KERNEL_OK")
</pallas_src>

<mosaic_0001>
module attributes {stable_mosaic.version = 11 : i64} {
  func.func @_onehot_gather_kernel(%arg0: i32, %arg1: memref<8xi32, #tpu.memory_space<smem>>, %arg2: memref<300x32xf32, #tpu.memory_space<vmem>>, %arg3: memref<8x12x32xf32, #tpu.memory_space<vmem>>) attributes {dimension_semantics = [#tpu.dimension_semantics<arbitrary>], iteration_bounds = array<i64: 1>, scalar_prefetch = 1 : i64, scratch_operands = 0 : i64, tpu.core_type = #tpu.core_type<tc>, window_params = [{pipeline_mode = #tpu.pipeline_mode<synchronous>, transform_indices = @transform_0, window_bounds = array<i64: 300, 32>}, {transform_indices = @transform_1, window_bounds = array<i64: 8, 12, 32>}]} {
    %c8_i32 = arith.constant 8 : i32
    %0 = arith.muli %arg0, %c8_i32 : i32
    %c0_i32 = arith.constant 0 : i32
    %1 = arith.addi %0, %c0_i32 : i32
    %2 = arith.index_cast %1 : i32 to index
    %3 = memref.load %arg1[%2] : memref<8xi32, #tpu.memory_space<smem>>
    %4 = arith.index_cast %3 : i32 to index
    %c0 = arith.constant 0 : index
    %5 = vector.load %arg2[%4, %c0] : memref<300x32xf32, #tpu.memory_space<vmem>>, vector<12x32xf32>
    %c0_0 = arith.constant 0 : index
    %c0_1 = arith.constant 0 : index
    %c0_2 = arith.constant 0 : index
    %6 = vector.load %arg3[%c0_0, %c0_1, %c0_2] : memref<8x12x32xf32, #tpu.memory_space<vmem>>, vector<1x12x32xf32>
    %7 = vector.shape_cast %6 : vector<1x12x32xf32> to vector<12x32xf32>
    %8 = vector.shape_cast %5 : vector<12x32xf32> to vector<1x12x32xf32>
    tpu.vector_store %arg3[%c0_0, %c0_1, %c0_2], %8 {strides = array<i32>} : memref<8x12x32xf32, #tpu.memory_space<vmem>>, vector<1x12x32xf32>,
    %c1_i32 = arith.constant 1 : i32
    %9 = arith.addi %0, %c1_i32 : i32
    %10 = arith.index_cast %9 : i32 to index
    %11 = memref.load %arg1[%10] : memref<8xi32, #tpu.memory_space<smem>>
    %12 = arith.index_cast %11 : i32 to index
    %c0_3 = arith.constant 0 : index
    %13 = vector.load %arg2[%12, %c0_3] : memref<300x32xf32, #tpu.memory_space<vmem>>, vector<12x32xf32>
    %c1 = arith.constant 1 : index
    %c0_4 = arith.constant 0 : index
    %c0_5 = arith.constant 0 : index
    %14 = vector.load %arg3[%c1, %c0_4, %c0_5] : memref<8x12x32xf32, #tpu.memory_space<vmem>>, vector<1x12x32xf32>
    %15 = vector.shape_cast %14 : vector<1x12x32xf32> to vector<12x32xf32>
    %16 = vector.shape_cast %13 : vector<12x32xf32> to vector<1x12x32xf32>
    tpu.vector_store %arg3[%c1, %c0_4, %c0_5], %16 {strides = array<i32>} : memref<8x12x32xf32, #tpu.memory_space<vmem>>, vector<1x12x32xf32>,
    %c2_i32 = arith.constant 2 : i32
    %17 = arith.addi %0, %c2_i32 : i32
    %18 = arith.index_cast %17 : i32 to index
    %19 = memref.load %arg1[%18] : memref<8xi32, #tpu.memory_space<smem>>
    %20 = arith.index_cast %19 : i32 to index
    %c0_6 = arith.constant 0 : index
    %21 = vector.load %arg2[%20, %c0_6] : memref<300x32xf32, #tpu.memory_space<vmem>>, vector<12x32xf32>
    %c2 = arith.constant 2 : index
    %c0_7 = arith.constant 0 : index
    %c0_8 = arith.constant 0 : index
    %22 = vector.load %arg3[%c2, %c0_7, %c0_8] : memref<8x12x32xf32, #tpu.memory_space<vmem>>, vector<1x12x32xf32>
    %23 = vector.shape_cast %22 : vector<1x12x32xf32> to vector<12x32xf32>
    %24 = vector.shape_cast %21 : vector<12x32xf32> to vector<1x12x32xf32>
    tpu.vector_store %arg3[%c2, %c0_7, %c0_8], %24 {strides = array<i32>} : memref<8x12x32xf32, #tpu.memory_space<vmem>>, vector<1x12x32xf32>,
    %c3_i32 = arith.constant 3 : i32
    %25 = arith.addi %0, %c3_i32 : i32
    %26 = arith.index_cast %25 : i32 to index
    %27 = memref.load %arg1[%26] : memref<8xi32, #tpu.memory_space<smem>>
    %28 = arith.index_cast %27 : i32 to index
    %c0_9 = arith.constant 0 : index
    %29 = vector.load %arg2[%28, %c0_9] : memref<300x32xf32, #tpu.memory_space<vmem>>, vector<12x32xf32>
    %c3 = arith.constant 3 : index
    %c0_10 = arith.constant 0 : index
    %c0_11 = arith.constant 0 : index
    %30 = vector.load %arg3[%c3, %c0_10, %c0_11] : memref<8x12x32xf32, #tpu.memory_space<vmem>>, vector<1x12x32xf32>
    %31 = vector.shape_cast %30 : vector<1x12x32xf32> to vector<12x32xf32>
    %32 = vector.shape_cast %29 : vector<12x32xf32> to vector<1x12x32xf32>
    tpu.vector_store %arg3[%c3, %c0_10, %c0_11], %32 {strides = array<i32>} : memref<8x12x32xf32, #tpu.memory_space<vmem>>, vector<1x12x32xf32>,
    %c4_i32 = arith.constant 4 : i32
    %33 = arith.addi %0, %c4_i32 : i32
    %34 = arith.index_cast %33 : i32 to index
    %35 = memref.load %arg1[%34] : memref<8xi32, #tpu.memory_space<smem>>
    %36 = arith.index_cast %35 : i32 to index
    %c0_12 = arith.constant 0 : index
    %37 = vector.load %arg2[%36, %c0_12] : memref<300x32xf32, #tpu.memory_space<vmem>>, vector<12x32xf32>
    %c4 = arith.constant 4 : index
    %c0_13 = arith.constant 0 : index
    %c0_14 = arith.constant 0 : index
    %38 = vector.load %arg3[%c4, %c0_13, %c0_14] : memref<8x12x32xf32, #tpu.memory_space<vmem>>, vector<1x12x32xf32>
    %39 = vector.shape_cast %38 : vector<1x12x32xf32> to vector<12x32xf32>
    %40 = vector.shape_cast %37 : vector<12x32xf32> to vector<1x12x32xf32>
    tpu.vector_store %arg3[%c4, %c0_13, %c0_14], %40 {strides = array<i32>} : memref<8x12x32xf32, #tpu.memory_space<vmem>>, vector<1x12x32xf32>,
    %c5_i32 = arith.constant 5 : i32
    %41 = arith.addi %0, %c5_i32 : i32
    %42 = arith.index_cast %41 : i32 to index
    %43 = memref.load %arg1[%42] : memref<8xi32, #tpu.memory_space<smem>>
    %44 = arith.index_cast %43 : i32 to index
    %c0_15 = arith.constant 0 : index
    %45 = vector.load %arg2[%44, %c0_15] : memref<300x32xf32, #tpu.memory_space<vmem>>, vector<12x32xf32>
    %c5 = arith.constant 5 : index
    %c0_16 = arith.constant 0 : index
    %c0_17 = arith.constant 0 : index
    %46 = vector.load %arg3[%c5, %c0_16, %c0_17] : memref<8x12x32xf32, #tpu.memory_space<vmem>>, vector<1x12x32xf32>
    %47 = vector.shape_cast %46 : vector<1x12x32xf32> to vector<12x32xf32>
    %48 = vector.shape_cast %45 : vector<12x32xf32> to vector<1x12x32xf32>
    tpu.vector_store %arg3[%c5, %c0_16, %c0_17], %48 {strides = array<i32>} : memref<8x12x32xf32, #tpu.memory_space<vmem>>, vector<1x12x32xf32>,
    %c6_i32 = arith.constant 6 : i32
    %49 = arith.addi %0, %c6_i32 : i32
    %50 = arith.index_cast %49 : i32 to index
    %51 = memref.load %arg1[%50] : memref<8xi32, #tpu.memory_space<smem>>
    %52 = arith.index_cast %51 : i32 to index
    %c0_18 = arith.constant 0 : index
    %53 = vector.load %arg2[%52, %c0_18] : memref<300x32xf32, #tpu.memory_space<vmem>>, vector<12x32xf32>
    %c6 = arith.constant 6 : index
    %c0_19 = arith.constant 0 : index
    %c0_20 = arith.constant 0 : index
    %54 = vector.load %arg3[%c6, %c0_19, %c0_20] : memref<8x12x32xf32, #tpu.memory_space<vmem>>, vector<1x12x32xf32>
    %55 = vector.shape_cast %54 : vector<1x12x32xf32> to vector<12x32xf32>
    %56 = vector.shape_cast %53 : vector<12x32xf32> to vector<1x12x32xf32>
    tpu.vector_store %arg3[%c6, %c0_19, %c0_20], %56 {strides = array<i32>} : memref<8x12x32xf32, #tpu.memory_space<vmem>>, vector<1x12x32xf32>,
    %c7_i32 = arith.constant 7 : i32
    %57 = arith.addi %0, %c7_i32 : i32
    %58 = arith.index_cast %57 : i32 to index
    %59 = memref.load %arg1[%58] : memref<8xi32, #tpu.memory_space<smem>>
    %60 = arith.index_cast %59 : i32 to index
    %c0_21 = arith.constant 0 : index
    %61 = vector.load %arg2[%60, %c0_21] : memref<300x32xf32, #tpu.memory_space<vmem>>, vector<12x32xf32>
    %c7 = arith.constant 7 : index
    %c0_22 = arith.constant 0 : index
    %c0_23 = arith.constant 0 : index
    %62 = vector.load %arg3[%c7, %c0_22, %c0_23] : memref<8x12x32xf32, #tpu.memory_space<vmem>>, vector<1x12x32xf32>
    %63 = vector.shape_cast %62 : vector<1x12x32xf32> to vector<12x32xf32>
    %64 = vector.shape_cast %61 : vector<12x32xf32> to vector<1x12x32xf32>
    tpu.vector_store %arg3[%c7, %c0_22, %c0_23], %64 {strides = array<i32>} : memref<8x12x32xf32, #tpu.memory_space<vmem>>, vector<1x12x32xf32>,
    return
  }
  func.func @transform_0(%arg0: i32, %arg1: memref<8xi32, #tpu.memory_space<smem>>) -> (i32, i32) {
    %c0_i32 = arith.constant 0 : i32
    %c0_i32_0 = arith.constant 0 : i32
    %c0_i32_1 = arith.constant 0 : i32
    return %c0_i32, %c0_i32_0 : i32, i32
  }
  func.func @transform_1(%arg0: i32, %arg1: memref<8xi32, #tpu.memory_space<smem>>) -> (i32, i32, i32) {
    %c0_i32 = arith.constant 0 : i32
    %c0_i32_0 = arith.constant 0 : i32
    %c0_i32_1 = arith.constant 0 : i32
    return %arg0, %c0_i32, %c0_i32_0 : i32, i32, i32
  }
}

</mosaic_0001>

<bundles_post_ra>
// kernel: one_hot_encoder_batched.1
= control target key start
LH: loop header
LB: loop body
LE: loop exit
PB: predicated region body
PF: predicated region fallthrough
CT: control target
= control target key end

     0   :  { %s241_s0 = inlined_call_operand.vmem [shape: s32[8], index: 0, kind: input, shape index: {}]   ;;  %s242_s1 = inlined_call_operand.vmem [shape: f32[300,32], index: 1, kind: input, shape index: {}]   ;;  %s243_s2 = inlined_call_operand.vmem [shape: f32[8,12,32], index: 2, kind: output, shape index: {}]  }
   0x1   :  { %s7_s11 = sshll.u32 %s241_s0, 4  ;;  %s8_s11 = int_to_ptr.vmem [resolvable:$true] %s7_s11 }
   0x2   :  { %s114_s12 = scalar_lea.vmem %s8_s11, 16  ;;  %p119_p1 = scmp.lt.s32.totalorder %s8_s11, %s8_s11 }
   0x3   :  { %p115_p0 = scmp.ne.s32.totalorder %s8_s11, %s114_s12  ;;  %p120_p2 = scmp.lt.s32.totalorder %s114_s12, %s114_s12 }
   0x5   :  { %p121_p3 = por %p120_p2, %p119_p1 }
   0x7   :  { %p122_p4 = pnand %p121_p3, %p115_p0 }
   0x9   :  { %125 = shalt.err (!%p122_p4)  }
   0xa   :  { %s128_s13 = smov [#allocation3]  }
   0xb   :  { %10 = dma.vmem_to_smem %s8_s11, 16, %s128_s13, [#allocation2] }
   0xc   :  { %126 = dma.done.wait [#allocation2], 16 }
   0xd   :  { %127 = vsyncadd [#allocation2], 4294967280 }
   0xe   :  { %12 = sfence }
   0xf   :  { %s16_s14 = sld [smem:[#allocation3]]  ;;  %vm20_vm0 = vcmask 261120   ;;  %vm22_vm1 = vcmask 257024  }
  0x10   :  { %s92_s15 = sld [smem:[#allocation3 + $0x1]] }
  0x11   :  { %s95_s16 = sld [smem:[#allocation3 + $0x2]] }
  0x12   :  { %s98_s17 = sld [smem:[#allocation3 + $0x3]] }
  0x13   :  { %s101_s18 = sld [smem:[#allocation3 + $0x4]] }
  0x14   :  { %s104_s0 = sld [smem:[#allocation3 + $0x5]] }
  0x15   :  { %s17_s21 = scalar_lea.vmem %s242_s1, %s16_s14  ;;  %s150_s22 = sld [smem:[#allocation3 + $0x6]] }
  0x16   :  { %v18_v0 = vld [vmem:[%s17_s21] sm:$0xff]  ;;  %v19_v1 = vld [vmem:[%s17_s21 + $0x8] sm:$0xf]  ;;  %s26_s25 = scalar_lea.vmem %s242_s1, %s92_s15  ;;  %s155_s26 = sld [smem:[#allocation3 + $0x7]] }
  0x17   :  { %21 = vst.msk [vmem:[%s243_s2] sm:$0xff] %vm20_vm0, %v18_v0  ;;  %v27_v2 = vld [vmem:[%s26_s25] sm:$0xff]  ;;  %v28_v3 = vld [vmem:[%s26_s25 + $0x8] sm:$0xf]  ;;  %s34_s5 = scalar_lea.vmem %s242_s1, %s95_s16 }
  0x18   :  { %23 = vst.msk [vmem:[%s243_s2 + $0x8] sm:$0xf] %vm22_vm1, %v19_v1  ;;  %94 = vst.msk [vmem:[%s243_s2 + $0x18] sm:$0xf] %vm22_vm1, %v28_v3  ;;  %v35_v4 = vld [vmem:[%s34_s5] sm:$0xff]  ;;  %s42_s12 = scalar_lea.vmem %s242_s1, %s98_s17 }
  0x19   :  { %93 = vst.msk [vmem:[%s243_s2 + $0x10] sm:$0xff] %vm20_vm0, %v27_v2  ;;  %v36_v5 = vld [vmem:[%s34_s5 + $0x8] sm:$0xf]  ;;  %96 = vst.msk [vmem:[%s243_s2 + $0x20] sm:$0xff] %vm20_vm0, %v35_v4  ;;  %v43_v6 = vld [vmem:[%s42_s12] sm:$0xff]  ;;  %s50_s21 = scalar_lea.vmem %s242_s1, %s101_s18 }
  0x1a   :  { %97 = vst.msk [vmem:[%s243_s2 + $0x28] sm:$0xf] %vm22_vm1, %v36_v5  ;;  %v44_v7 = vld [vmem:[%s42_s12 + $0x8] sm:$0xf]  ;;  %v51_v8 = vld [vmem:[%s50_s21] sm:$0xff]  ;;  %s58_s29 = scalar_lea.vmem %s242_s1, %s104_s0 }
  0x1b   :  { %99 = vst.msk [vmem:[%s243_s2 + $0x30] sm:$0xff] %vm20_vm0, %v43_v6  ;;  %v52_v9 = vld [vmem:[%s50_s21 + $0x8] sm:$0xf]  ;;  %102 = vst.msk [vmem:[%s243_s2 + $0x40] sm:$0xff] %vm20_vm0, %v51_v8  ;;  %v59_v10 = vld [vmem:[%s58_s29] sm:$0xff]  ;;  %s66_s7 = scalar_lea.vmem %s242_s1, %s150_s22 }
  0x1c   :  { %100 = vst.msk [vmem:[%s243_s2 + $0x38] sm:$0xf] %vm22_vm1, %v44_v7  ;;  %103 = vst.msk [vmem:[%s243_s2 + $0x48] sm:$0xf] %vm22_vm1, %v52_v9  ;;  %v60_v11 = vld [vmem:[%s58_s29 + $0x8] sm:$0xf]  ;;  %s74_s13 = scalar_lea.vmem %s242_s1, %s155_s26 }
  0x1d   :  { %105 = vst.msk [vmem:[%s243_s2 + $0x50] sm:$0xff] %vm20_vm0, %v59_v10  ;;  %v67_v12 = vld [vmem:[%s66_s7] sm:$0xff]  ;;  %v68_v13 = vld [vmem:[%s66_s7 + $0x8] sm:$0xf] }
  0x1e   :  { %106 = vst.msk [vmem:[%s243_s2 + $0x58] sm:$0xf] %vm22_vm1, %v60_v11  ;;  %109 = vst.msk [vmem:[%s243_s2 + $0x68] sm:$0xf] %vm22_vm1, %v68_v13  ;;  %v75_v14 = vld [vmem:[%s74_s13] sm:$0xff] }
  0x1f   :  { %108 = vst.msk [vmem:[%s243_s2 + $0x60] sm:$0xff] %vm20_vm0, %v67_v12  ;;  %v76_v15 = vld [vmem:[%s74_s13 + $0x8] sm:$0xf]  ;;  %111 = vst.msk [vmem:[%s243_s2 + $0x70] sm:$0xff] %vm20_vm0, %v75_v14 }
  0x20   :  { %112 = vst.msk [vmem:[%s243_s2 + $0x78] sm:$0xf] %vm22_vm1, %v76_v15 }

</bundles_post_ra>
